<compile_context>
chip_gen: v7x
topology: tpu7x:2x2x1
jax: 0.10.0
libtpu: 0.0.40
codegen_flags: <defaults>
</compile_context>

<pallas_src>
import functools

import jax
import jax.numpy as jnp
from jax.experimental import pallas as pl
from jax.experimental.pallas import tpu as pltpu


def _fcn_kernel(x_ref, w_ref, bias_ref, o_ref, *, Kt, L_out, pad_l, pad_r, KC_pad):
    """One batch block: im2col in registers -> single MXU matmul -> bias + ReLU.

    x_ref:    (B_blk, C, Lk)          bf16 input block (already space-to-depth'd
                                      for the strided branch)
    w_ref:    (C_out, KC_pad)         bf16 BN-scale-folded weights (tap-major rows)
    bias_ref: (C_out, 1)              f32 fused bias = scale*(conv_bias-mean)+beta
    o_ref:    (C_out, B_blk*L_out)    lane-dense output slab for this block
    """
    xb = x_ref[...]                                   # (B_blk, C, Lk)
    B_blk, C, _ = xb.shape

    # 1) Zero padding (stride-1 'same' branch) as a register concat — no VMEM
    #    scratch, no per-step zero-fill stores.  pad_l/pad_r are static.
    if pad_l or pad_r:
        parts = []
        if pad_l:
            parts.append(jnp.zeros((B_blk, C, pad_l), xb.dtype))
        parts.append(xb)
        if pad_r:
            parts.append(jnp.zeros((B_blk, C, pad_r), xb.dtype))
        xp = jnp.concatenate(parts, axis=-1)          # (B_blk, C, L_pad)
    else:
        xp = xb

    # 2) im2col in registers: stack the Kt tap windows of each batch element
    #    (rows = tap-major, channel-minor) and pack batch elements along lanes.
    slabs = []
    for b in range(B_blk):                            # static, unrolled
        taps = [xp[b, :, k:k + L_out] for k in range(Kt)]      # (C, L_out) each
        slabs.append(taps[0] if Kt == 1 else jnp.concatenate(taps, axis=0))
    cols = slabs[0] if B_blk == 1 else jnp.concatenate(slabs, axis=1)
    # (Kt*C, B_blk*L_out)

    # 3) Zero rows up to the sublane-aligned contraction size (exact: the
    #    matching weight rows are zero too).
    KC = Kt * C
    if KC_pad > KC:
        cols = jnp.concatenate(
            [cols, jnp.zeros((KC_pad - KC, B_blk * L_out), cols.dtype)], axis=0)

    # 4) Single bf16 MXU matmul with f32 accumulation, fused BN bias + ReLU,
    #    one lane-dense full-block store.
    acc = jnp.dot(w_ref[...], cols, preferred_element_type=jnp.float32)
    y = jnp.maximum(acc + bias_ref[...], 0.0)
    o_ref[...] = y.astype(o_ref.dtype)


def fcn_forward(x, weight, conv_bias, bn_gamma, bn_beta, bn_mean, bn_var,
                *, num_kernels, strides, eps=1e-5, batch_block=None,
                out_dtype=None):
    """FCN forward: Conv1d (per-branch padding/stride) -> BatchNorm1d(eval) -> ReLU."""
    N, C_in, L = x.shape
    C_out = weight.shape[0]
    K = int(num_kernels)
    s = int(strides)
    out_dtype = x.dtype if out_dtype is None else out_dtype

    # Fold conv bias + eval-mode BatchNorm into the weights (exact, in f32).
    inv_std = 1.0 / jnp.sqrt(bn_var.astype(jnp.float32) + eps)
    scale = bn_gamma.astype(jnp.float32) * inv_std                       # (C_out,)
    bias = scale * (conv_bias.astype(jnp.float32)
                    - bn_mean.astype(jnp.float32)) + bn_beta.astype(jnp.float32)
    w_f = weight.astype(jnp.float32) * scale[:, None, None]              # (C_out,C_in,K)

    x_bf = x.astype(jnp.bfloat16)    # halve x HBM read; MXU runs bf16

    if s >= 2:
        # FCN_block_str: padding = int(K * 1/2), stride = s.
        pad_l = pad_r = K // 2
        L_pad = L + pad_l + pad_r
        L_out = (L_pad - K) // s + 1
        # Exact polyphase (space-to-depth): stride-s conv == stride-1 conv over
        # C_in*s channels with ceil(K/s) taps.  Kernel never needs strided reads.
        Kt = -(-K // s)
        C_k = C_in * s
        Lq = -(-L_pad // s)
        L_pad2 = Lq * s
        x_p = jnp.pad(x_bf, ((0, 0), (0, 0), (pad_l, pad_r + (L_pad2 - L_pad))))
        x_k = (x_p.reshape(N, C_in, Lq, s)
                  .transpose(0, 1, 3, 2)
                  .reshape(N, C_k, Lq))                       # channel c' = c*s + r
        Lk = Lq
        kpad_l = kpad_r = 0
        # Weight rows match im2col rows: row = q*(C_in*s) + c*s + r <-> tap q*s+r.
        w_p = jnp.pad(w_f, ((0, 0), (0, 0), (0, Kt * s - K)))
        w2 = (w_p.reshape(C_out, C_in, Kt, s)
                 .transpose(0, 2, 1, 3)
                 .reshape(C_out, Kt * C_k))
    else:
        # FCN_block_no_str: padding = 'same', stride = 1 (pad in-kernel).
        total = K - 1
        kpad_l = total // 2
        kpad_r = total - kpad_l
        L_out = L
        Kt = K
        C_k = C_in
        x_k = x_bf
        Lk = L
        # Row (k*C_in + c) <-> tap k, channel c.
        w2 = jnp.transpose(w_f, (0, 2, 1)).reshape(C_out, K * C_in)

    # Pad the contraction dim to a multiple of the bf16 sublane tile (16).
    KC = Kt * C_k
    KC_pad = -(-KC // 16) * 16
    if KC_pad > KC:
        w2 = jnp.pad(w2, ((0, 0), (0, KC_pad - KC)))
    w2 = w2.astype(jnp.bfloat16)
    bias2 = bias.reshape(C_out, 1)

    # Batch blocking: target >=512 output lanes per step, but keep the grid
    # >= 2 steps when possible so v7x can shard blocks across its two TCs.
    if batch_block is None:
        B_blk = max(1, min(N, -(-512 // max(L_out, 1))))
    else:
        B_blk = max(1, min(int(batch_block), N))
    if N >= 2 and -(-N // B_blk) < 2:
        B_blk = -(-N // 2)
    N_pad = -(-N // B_blk) * B_blk
    if N_pad != N:
        x_k = jnp.pad(x_k, ((0, N_pad - N), (0, 0), (0, 0)))
    G = N_pad // B_blk

    kernel = functools.partial(
        _fcn_kernel, Kt=Kt, L_out=L_out, pad_l=kpad_l, pad_r=kpad_r, KC_pad=KC_pad)

    # VMEM budget derived from actual block sizes (double-buffered in/out blocks
    # + params), with headroom, capped well under v7x's 64 MiB physical VMEM.
    out_isz = jnp.dtype(out_dtype).itemsize
    needed = (2 * B_blk * C_k * Lk * 2                 # x blocks (bf16, 2 buffers)
              + 2 * C_out * B_blk * L_out * out_isz    # out blocks (2 buffers)
              + C_out * KC_pad * 2 + C_out * 4)        # weights + bias
    vmem_limit = int(min(48 * 2**20, max(16 * 2**20, 8 * needed)))

    y = pl.pallas_call(
        kernel,
        out_shape=jax.ShapeDtypeStruct((G, C_out, B_blk * L_out), out_dtype),
        grid_spec=pltpu.PrefetchScalarGridSpec(
            num_scalar_prefetch=0,
            grid=(G,),
            in_specs=[
                pl.BlockSpec((B_blk, C_k, Lk), lambda g: (g, 0, 0)),
                pl.BlockSpec((C_out, KC_pad), lambda g: (0, 0)),
                pl.BlockSpec((C_out, 1), lambda g: (0, 0)),
            ],
            out_specs=pl.BlockSpec((None, C_out, B_blk * L_out),
                                   lambda g: (g, 0, 0)),
        ),
        compiler_params=pltpu.CompilerParams(
            dimension_semantics=("parallel",),
            vmem_limit_bytes=vmem_limit,
        ),
    )(x_k, w2, bias2)

    # Lane-dense kernel layout -> (N, C_out, L_out).  Pure wrapper-side plumbing.
    y = (y.reshape(G, C_out, B_blk, L_out)
          .transpose(0, 2, 1, 3)
          .reshape(N_pad, C_out, L_out))
    return y[:N] if N_pad != N else y


def _reference(x, weight, conv_bias, gamma, beta, mean, var, *, K, strides, eps=1e-5):
    """Pure-JAX f32 reference mirroring the PyTorch forward (eval-mode BN)."""
    if strides >= 2:
        pad_l = pad_r = int(K / 2)
        stride = int(strides)
    else:
        total = K - 1
        pad_l = total // 2
        pad_r = total - pad_l
        stride = 1
    x_pad = jnp.pad(x, ((0, 0), (0, 0), (pad_l, pad_r)))
    y = jax.lax.conv_general_dilated(
        x_pad, weight, window_strides=(stride,), padding="VALID",
        dimension_numbers=("NCH", "OIH", "NCH"),
        preferred_element_type=jnp.float32)
    y = y + conv_bias[None, :, None]
    y = gamma[None, :, None] * (y - mean[None, :, None]) / jnp.sqrt(
        var[None, :, None] + eps) + beta[None, :, None]
    return jnp.maximum(y, 0.0)


if __name__ == "__main__":
    root = jax.random.PRNGKey(0)

    configs = [
        # (N, C_in, C_out, L, K, strides, batch_block)
        (2, 4, 8, 16, 5, 1, 8),    # 'same' branch (stride 1)
        (2, 4, 8, 16, 5, 2, 8),    # strided branch (stride 2, polyphase)
        (5, 3, 6, 33, 4, 1, 4),    # even kernel, batch not a multiple of the block
        (5, 3, 6, 33, 3, 3, 4),    # stride 3, batch remainder
    ]

    for idx, (N, C_in, C_out, L, K, strides, batch_block) in enumerate(configs):
        key = jax.random.fold_in(root, idx)
        kx, kw, kb, kg, kbe, km, kv = jax.random.split(key, 7)

        x = jax.random.normal(kx, (N, C_in, L), jnp.float32)
        weight = 0.3 * jax.random.normal(kw, (C_out, C_in, K), jnp.float32)
        conv_bias = 0.1 * jax.random.normal(kb, (C_out,), jnp.float32)
        bn_gamma = 1.0 + 0.1 * jax.random.normal(kg, (C_out,), jnp.float32)
        bn_beta = 0.1 * jax.random.normal(kbe, (C_out,), jnp.float32)
        bn_mean = 0.1 * jax.random.normal(km, (C_out,), jnp.float32)
        bn_var = jax.random.uniform(kv, (C_out,), jnp.float32, minval=0.5, maxval=1.5)

        y = fcn_forward(x, weight, conv_bias, bn_gamma, bn_beta, bn_mean, bn_var,
                        num_kernels=K, strides=strides, batch_block=batch_block)
        y = jax.block_until_ready(y)

        y_ref = _reference(x, weight, conv_bias, bn_gamma, bn_beta, bn_mean, bn_var,
                           K=K, strides=strides)
        assert y.shape == y_ref.shape, (y.shape, y_ref.shape)
        # bf16 MXU inputs with f32 accumulation -> compare against the pure-f32
        # reference with a bf16-appropriate tolerance.
        err = jnp.max(jnp.abs(y - y_ref))
        assert jnp.allclose(y, y_ref, atol=3e-2, rtol=2e-2), (
            f"mismatch (cfg {idx}, strides={strides}): max abs err {err}")

    print("KERNEL_OK")
</pallas_src>

<mosaic_0001>
module attributes {stable_mosaic.version = 11 : i64} {
  func.func @_fcn_kernel(%arg0: i32, %arg1: memref<1x4x16xbf16, #tpu.memory_space<vmem>>, %arg2: memref<8x32xbf16, #tpu.memory_space<vmem>>, %arg3: memref<8x1xf32, #tpu.memory_space<vmem>>, %arg4: memref<1x8x16xf32, #tpu.memory_space<vmem>>) attributes {dimension_semantics = [#tpu.dimension_semantics<parallel>], iteration_bounds = array<i64: 2>, scalar_prefetch = 0 : i64, scratch_operands = 0 : i64, tpu.core_type = #tpu.core_type<tc>, window_params = [{transform_indices = @transform_0, window_bounds = array<i64: 1, 4, 16>}, {pipeline_mode = #tpu.pipeline_mode<synchronous>, transform_indices = @transform_1, window_bounds = array<i64: 8, 32>}, {pipeline_mode = #tpu.pipeline_mode<synchronous>, transform_indices = @transform_2, window_bounds = array<i64: 8, 1>}, {transform_indices = @transform_3, window_bounds = array<i64: 1, 8, 16>}]} {
    %c0 = arith.constant 0 : index
    %c0_0 = arith.constant 0 : index
    %c0_1 = arith.constant 0 : index
    %0 = vector.load %arg1[%c0, %c0_0, %c0_1] : memref<1x4x16xbf16, #tpu.memory_space<vmem>>, vector<1x4x16xbf16>
    %cst = arith.constant 0.000000e+00 : bf16
    %1 = vector.broadcast %cst : bf16 to vector<1x4x2xbf16>
    %cst_2 = arith.constant 0.000000e+00 : bf16
    %2 = vector.broadcast %cst_2 : bf16 to vector<1x4x2xbf16>
    %3 = tpu.concatenate %1, %0, %2 in 2 : vector<1x4x2xbf16>, vector<1x4x16xbf16>, vector<1x4x2xbf16> -> vector<1x4x20xbf16>
    %4 = vector.extract_strided_slice %3 {offsets = [0, 0, 0], sizes = [1, 4, 16], strides = [1, 1, 1]} : vector<1x4x20xbf16> to vector<1x4x16xbf16>
    %5 = vector.shape_cast %4 : vector<1x4x16xbf16> to vector<4x16xbf16>
    %6 = vector.extract_strided_slice %3 {offsets = [0, 0, 1], sizes = [1, 4, 16], strides = [1, 1, 1]} : vector<1x4x20xbf16> to vector<1x4x16xbf16>
    %7 = vector.shape_cast %6 : vector<1x4x16xbf16> to vector<4x16xbf16>
    %8 = vector.extract_strided_slice %3 {offsets = [0, 0, 2], sizes = [1, 4, 16], strides = [1, 1, 1]} : vector<1x4x20xbf16> to vector<1x4x16xbf16>
    %9 = vector.shape_cast %8 : vector<1x4x16xbf16> to vector<4x16xbf16>
    %10 = vector.extract_strided_slice %3 {offsets = [0, 0, 3], sizes = [1, 4, 16], strides = [1, 1, 1]} : vector<1x4x20xbf16> to vector<1x4x16xbf16>
    %11 = vector.shape_cast %10 : vector<1x4x16xbf16> to vector<4x16xbf16>
    %12 = vector.extract_strided_slice %3 {offsets = [0, 0, 4], sizes = [1, 4, 16], strides = [1, 1, 1]} : vector<1x4x20xbf16> to vector<1x4x16xbf16>
    %13 = vector.shape_cast %12 : vector<1x4x16xbf16> to vector<4x16xbf16>
    %14 = tpu.concatenate %5, %7, %9, %11, %13 in 0 : vector<4x16xbf16>, vector<4x16xbf16>, vector<4x16xbf16>, vector<4x16xbf16>, vector<4x16xbf16> -> vector<20x16xbf16>
    %cst_3 = arith.constant 0.000000e+00 : bf16
    %15 = vector.broadcast %cst_3 : bf16 to vector<12x16xbf16>
    %16 = tpu.concatenate %14, %15 in 0 : vector<20x16xbf16>, vector<12x16xbf16> -> vector<32x16xbf16>
    %c0_4 = arith.constant 0 : index
    %c0_5 = arith.constant 0 : index
    %17 = vector.load %arg2[%c0_4, %c0_5] : memref<8x32xbf16, #tpu.memory_space<vmem>>, vector<8x32xbf16>
    %cst_6 = arith.constant dense<0.000000e+00> : vector<8x16xf32>
    %18 = tpu.matmul %17, %16, %cst_6 {dimension_numbers = #tpu.dot_dimension_numbers<[1], [0], [0], [1], [0, 0, 1, 1], [], []>} : vector<8x32xbf16>, vector<32x16xbf16>, vector<8x16xf32> -> vector<8x16xf32>
    %c0_7 = arith.constant 0 : index
    %c0_8 = arith.constant 0 : index
    %19 = vector.load %arg3[%c0_7, %c0_8] : memref<8x1xf32, #tpu.memory_space<vmem>>, vector<8x1xf32>
    %20 = vector.broadcast %19 : vector<8x1xf32> to vector<8x16xf32>
    %21 = arith.addf %18, %20 : vector<8x16xf32>
    %cst_9 = arith.constant 0.000000e+00 : f32
    %22 = vector.broadcast %cst_9 : f32 to vector<8x16xf32>
    %23 = arith.maximumf %21, %22 : vector<8x16xf32>
    %c0_10 = arith.constant 0 : index
    %c0_11 = arith.constant 0 : index
    %c0_12 = arith.constant 0 : index
    %24 = vector.load %arg4[%c0_10, %c0_11, %c0_12] : memref<1x8x16xf32, #tpu.memory_space<vmem>>, vector<1x8x16xf32>
    %25 = vector.shape_cast %24 : vector<1x8x16xf32> to vector<8x16xf32>
    %26 = vector.shape_cast %23 : vector<8x16xf32> to vector<1x8x16xf32>
    tpu.vector_store %arg4[%c0_10, %c0_11, %c0_12], %26 {strides = array<i32>} : memref<1x8x16xf32, #tpu.memory_space<vmem>>, vector<1x8x16xf32>,
    return
  }
  func.func @transform_0(%arg0: i32) -> (i32, i32, i32) {
    %c0_i32 = arith.constant 0 : i32
    %c0_i32_0 = arith.constant 0 : i32
    %c0_i32_1 = arith.constant 0 : i32
    return %arg0, %c0_i32, %c0_i32_0 : i32, i32, i32
  }
  func.func @transform_1(%arg0: i32) -> (i32, i32) {
    %c0_i32 = arith.constant 0 : i32
    %c0_i32_0 = arith.constant 0 : i32
    %c0_i32_1 = arith.constant 0 : i32
    return %c0_i32, %c0_i32_0 : i32, i32
  }
  func.func @transform_2(%arg0: i32) -> (i32, i32) {
    %c0_i32 = arith.constant 0 : i32
    %c0_i32_0 = arith.constant 0 : i32
    %c0_i32_1 = arith.constant 0 : i32
    return %c0_i32, %c0_i32_0 : i32, i32
  }
  func.func @transform_3(%arg0: i32) -> (i32, i32, i32) {
    %c0_i32 = arith.constant 0 : i32
    %c0_i32_0 = arith.constant 0 : i32
    %c0_i32_1 = arith.constant 0 : i32
    return %arg0, %c0_i32, %c0_i32_0 : i32, i32, i32
  }
}

</mosaic_0001>

<bundles_post_ra>
// kernel: tpu_custom_call.1
= control target key start
LH: loop header
LB: loop body
LE: loop exit
PB: predicated region body
PF: predicated region fallthrough
CT: control target
= control target key end

     0   :  { %8 = vsyncpa [#allocation3], 0  ;;  %s607_s0 = inlined_call_operand.vmem [shape: bf16[2,4,16], index: 0, kind: input, shape index: {}]   ;;  %s608_s1 = inlined_call_operand.vmem [shape: bf16[8,32], index: 1, kind: input, shape index: {}]   ;;  %s609_s2 = inlined_call_operand.vmem [shape: f32[8,1], index: 2, kind: input, shape index: {}]   ;;  %s610_s3 = inlined_call_operand.hbm [shape: f32[2,8,16], index: 3, kind: output, shape index: {}]  }
   0x1   :  { %10 = vsyncpa [#allocation3 + $0x1], 0  ;;  %s501_s12 = smov 0   ;;  %s503_s13 = smov 0  }
   0x2   :  { %s505_s14 = smov 0   ;;  %s507_s15 = smov 0  }
   0x3 LB: > { %s522_s16 = sadd.s32 4294967295, %s470_s15   ;;  %s336_s17 = sadd.s32 4294967294, %s470_s15   ;;  %s470_s15 = sphi %s507_s15, %s616_s15   ;;  %s466_s14 = sphi %s505_s14, %s615_s14   ;;  %s462_s13 = sphi %s503_s13, %s614_s13   ;;  %s458_s12 = sphi %s501_s12, %s613_s12  }
   0x4   : > { %s526_s18 = sadd.s32 1, %s470_s15   ;;  %s91_s19 = sadd.s32 1, %s466_s14 }
   0x5   : > { %s88_s20 = ssub.s32 %s470_s15, %s526_s18  ;;  %p101_p0 = scmp.ne.s32.totalorder %s466_s14, %s462_s13 }
   0x6   : > { %p89_p1 = scmp.eq.s32.totalorder %s88_s20, 0  ;;  %p102_p2 = scmp.eq.s32.totalorder %s522_s16, 1 }
   0x7   : > { %p107_p3 = scmp.ne.s32.totalorder %s462_s13, %s458_s12  ;;  %p108_p4 = scmp.eq.s32.totalorder %s336_s17, 1 }
   0x8   : > { %s537_s21 = scalar_select %p89_p1, %s466_s14, %s91_s19  }
   0x9   : > { %p539_p5 = por %p102_p2, %p101_p0  ;;  %p543_p6 = por %p108_p4, %p107_p3 }
   0xa   : > { %p339_p7 = scmp.ge.s32.totalorder %s470_s15, 1  ;;  %p139_p8 = scmp.lt.s32.totalorder %s470_s15, 3 }
   0xc   : > { %p140_p9 = pnand %p339_p7, %p139_p8 }
   0xd   : > { %p162_p10 = scmp.lt.s32.totalorder (!%p140_p9), %s522_s16, 1  ;;  %s472_s29 = smov (!%p140_p9), 2   ;;  %v473_v1 = vmov (!%p140_p9), 0.0   ;;  %vm178_vm0 = vcmask (!%p140_p9), 15360   ;;  %vm182_vm1 = vcmask (!%p140_p9), 146432   ;;  %vm474_vm2 = vmmov (!%p140_p9), 0  }
   0xe   : > { %143 = sbr.rel (%p140_p9) target bundleno = 502 (0x1f6), region = 32  ;;  %351 = vmatprep.subr.bf16.mxu0 (!%p140_p9), %v473_v1  ;;  %355 = vmatprep.mubr.msk.bf16.mxu0 (!%p140_p9), %vm474_vm2, %v473_v1  ;;  %s475_s30 = smov (!%p140_p9), 126   ;;  %v477_v7 = vmov (!%p140_p9), 0   ;;  %v210_v9 = vld [vmem:[%s609_s2] sm:$0xff] (!%p140_p9)  ;;  %vm196_vm3 = vcmask (!%p140_p9), 1041408   ;;  %vm199_vm4 = vcmask (!%p140_p9), 1043456  }
   0xf   : > { %s476_s4 = smov (!%p140_p9), 127   ;;  %406 = vset.pattern.permute.xlu1 (!%p140_p9), %v477_v7  ;;  %407 = vset.pattern.permute.xlu0 (!%p140_p9), %v477_v7  ;;  %s478_s5 = smov (!%p140_p9), 125   ;;  %vm202_vm5 = vcmask (!%p140_p9), 1045504   ;;  %v209_v18 = vld [vmem:[%s608_s1] sm:$0xf] (!%p140_p9)  ;;  %vm216_vm6 = vcmask (!%p140_p9), 261120  }
  0x10   : > { %s479_s6 = smov (!%p140_p9), 124   ;;  %s159_s11 = sand.u32 (!%p140_p9), 1, %s462_s13   ;;  %vm261_vm7 = vcmask (!%p140_p9), 130048  }
  0x11   : > { %s340_s17 = sshll.u32 (!%p140_p9), %s159_s11, 3  ;;  %s345_s19 = sshll.u32 (!%p140_p9), %s522_s16, 7 }
  0x12   : > { %s161_s20 = scalar_lea.vmem (!%p140_p9), [#allocation2], %s340_s17  ;;  %s565_s27 = scalar_lea.hbm (!%p140_p9), %s610_s3, %s345_s19 }
  0x15   : > { %s163_s24 = scalar_select %p162_p10, %s522_s16, 1 }
  0x16   : > { %s264_s16 = scalar_lea.sflag [#allocation3], %s159_s11 }
  0x17   : > { %s341_s25 = sshll.u32 %s163_s24, 1  ;;  %s277_s24 = sshll.u32 %s161_s20, 4  ;;  %s567_s24 = int_to_ptr.vmem [resolvable:$true] %s277_s24 }
  0x18   : > { %s165_s28 = scalar_lea.vmem %s607_s0, %s341_s25 }
  0x19   : > { %v342_v0 = vld.sshfl [vmem:[%s165_s28] sm:$0x3 pattern:$0x76325410]  ;;  %s408_s28 = scalar_lea.vmem %s567_s24, 128 }
  0x1a   : > { %176 = vrot.lane.b32.xlu0 %v342_v0, %s472_s29  ;;  %p409_p11 = scmp.ne.s32.totalorder %s567_s24, %s408_s28  ;;  %s480_s29 = smov [#allocation2]  }
  0x1c   : > { %p410_p12 = pnand %p409_p11, %p539_p5 }
  0x1e   : > { %p411_p13 = pneg %p410_p12 }
  0x8c   : > { %v177_v2 = vpop.permute.xlu0 %176 }
  0x8d   : > { %v181_v3 = vsel %vm178_vm0, 0, %v177_v2 }
  0x8e   : > { %v183_v4 = vsel %vm182_vm1, %v181_v3, 0 }
  0x8f   : > { %v188_v5 = vrot.slane %v183_v4, 4  ;;  %v185_v6 = vrot.slane %v183_v4, 6  ;;  %v191_v8 = vrot.slane %v183_v4, 2 }
  0x91   : > { %189 = vrot.lane.b32.xlu1 %v188_v5, %s475_s30  ;;  %186 = vrot.lane.b32.xlu0 %v185_v6, %s476_s4  ;;  %s412_s30 = sshll.u32 %s480_s29, 4  ;;  %s413_s30 = int_to_ptr.vmem [resolvable:$false] %s412_s30 }
  0x92   : > { %s414_s4 = scalar_lea.vmem %s413_s30, 256  ;;  %p415_p0 = scmp.lt.s32.totalorder %s567_s24, %s413_s30 }
  0x93   : > { %p416_p1 = scmp.lt.s32.totalorder %s414_s4, %s408_s28 }
  0x95   : > { %192 = vrot.lane.b32.xlu1 %v191_v8, %s478_s5  ;;  %194 = vrot.lane.b32.xlu0 %v183_v4, %s479_s6  ;;  %p417_p2 = por %p416_p1, %p415_p0 }
  0x97   : > { %p418_p3 = pnand %p417_p2, %p411_p13 }
  0x99   : > { %213 = vperm.xlu1 %406, %v210_v9  }
 0x103   : > { %v190_v10 = vpop.permute.xlu1 %189  ;;  %v187_v11 = vpop.permute.xlu0 %186 }
 0x104   : > { %v198_v12 = vsel %vm196_vm3, %v183_v4, %v187_v11 }
 0x105   : > { %v201_v14 = vsel %vm199_vm4, %v198_v12, %v190_v10 }
 0x107   : > { %v193_v13 = vpop.permute.xlu1 %192  ;;  %v195_v16 = vpop.permute.xlu0 %194 }
 0x108   : > { %v204_v15 = vsel %vm202_vm5, %v201_v14, %v193_v13  ;;  %v207_v17 = vsel %vm196_vm3, %v195_v16, 0 }
 0x109   : > { %352 = vmatpush3.bf16.msra.mxu0 %v204_v15 }
 0x10a   : > { %353 = vmatprep.subr.bf16.mxu0 %v473_v1 }
 0x10d   : > { %354 = vmatpush3.bf16.msra.mxu0 %v207_v17 }
 0x110   : > { %356 = vmatmul.mubr.msk.bf16.vlgmr.msra.gmra.mrb[0].mxu0 %vm216_vm6, %v209_v18 }
 0x118   : > { %v214_v19 = vpop.permute.xlu1 %213 }
 0x1e3   : > { %v254_v20 = vpop.f32.mrb[0].mxu0 }
 0x1e4   : > { %v255_v21 = vadd.f32 %v254_v20, %v214_v19  ;;  %v357_v22 = vpop.f32.mrb[1].mxu0 }
 0x1e5   : > { %v257_v23 = vpop.f32.mrb[2].mxu0 }
 0x1e6   : > { %v260_v24 = vmax.f32 %v255_v21, 0.0  ;;  %v358_v25 = vpop.f32.mrb[3].mxu0 }
 0x1e8   : > { %262 = vst.msk [vmem:[%s161_s20] sm:$0xff] %vm261_vm7, %v260_v24 }
 0x1e9   : > { %421 = shalt.err (!%p418_p3)
}
 0x1ea   : > { %s422_s5 = scalar_lea.hbm %s565_s27, 128  ;;  %s426_s8 = scalar_lea.hbm %s610_s3, 256 }
 0x1eb   : > { %p423_p4 = scmp.ne.s32.totalorder %s565_s27, %s422_s5  ;;  %p427_p9 = scmp.lt.u32.totalorder %s565_s27, %s610_s3 }
 0x1ec   : > { %p428_p10 = scmp.lt.u32.totalorder %s426_s8, %s422_s5  ;;  %p430_p12 = scmp.lt.u32.totalorder %s422_s5, %s565_s27 }
 0x1ed   : > { %p424_p7 = pnand %p423_p4, %p539_p5 }
 0x1ee   : > { %p429_p11 = por %p428_p10, %p427_p9 }
 0x1ef   : > { %p425_p8 = pneg %p424_p7 }
 0x1f0   : > { %p431_p13 = por %p430_p12, %p429_p11 }
 0x1f2   : > { %p432_p0 = pnand %p431_p13, %p425_p8 }
 0x1f4   : > { %435 = shalt.err (!%p432_p0)
}
 0x1f5   : > { %359 = dma.vmem_to_hbm [thread:$0]  (%p539_p5), %s567_s24, 128, %s565_s27, %s264_s16  }
 0x1f6 PF: > { %p365_p1 = scmp.ge.s32.totalorder %s470_s15, 2  ;;  %s289_s11 = sand.u32 1, %s458_s12  }
 0x1f7   : > { %s290_s17 = scalar_lea.sflag [#allocation3], %s289_s11 }
 0x1f8   : > { %p362_p2 = pnand %p365_p1, %p543_p6 }
 0x1fa   : > { %453 = dma.done.wait (!%p362_p2), %s290_s17, 128  }
 0x1fb   : > { %455 = vsyncadd (!%p362_p2), %s290_s17, 4294967168  ;;  %p13_p3 = scmp.ge.s32.totalorder %s526_s18, 4   ;;  %s613_s12 = smov %s462_s13 }
 0x1fc   : > { %s614_s13 = smov %s466_s14  ;;  %s615_s14 = smov %s537_s21 }
 0x1fd   : > { %s616_s15 = smov %s526_s18  ;;  %15 = sbr.rel (!%p13_p3) target bundleno = 3 (0x3), region = 67 }
 0x204   :  { %295 = vsyncpa [#allocation3], 1 }
 0x205   :  { %297 = vsyncpa [#allocation3 + $0x1], 1 }

</bundles_post_ra>
